<compile_context>
chip_gen: v6e
topology: v6e:2x2x1
jax: 0.10.0
libtpu: 0.0.40
codegen_flags: <defaults>
</compile_context>

<pallas_src>
import jax
import jax.numpy as jnp
from jax.experimental import pallas as pl
from jax.experimental.pallas import tpu as pltpu


def _round_up(x, m):
    return (x + m - 1) // m * m


def _vmem_capacity_bytes():
    try:
        return int(pltpu.get_tpu_info().vmem_capacity_bytes)
    except Exception:
        return 128 << 20  # conservative default (v5e/v6e physical VMEM)


def _num_tensorcores():
    try:
        info = pltpu.get_tpu_info()
        for attr in ("num_cores", "tensor_cores_per_chip", "num_tensorcores",
                     "cores_per_chip"):
            v = getattr(info, attr, None)
            if v:
                return max(1, int(v))
    except Exception:
        pass
    return 1


def _make_ffn_kernel(d_valid, d_pad, dff_pad, chunk, out_dtype):
    """d_valid: real d_model; d_pad/dff_pad: lane-padded dims; chunk | dff_pad."""
    n_chunks = dff_pad // chunk

    def kernel(x_ref, w1_ref, b1_ref, w2_ref, b2_ref, g_ref, beta_ref, o_ref):
        x = x_ref[...]                               # (TM, d_pad), native dtype
        xf = x.astype(jnp.float32)
        tm = x.shape[0]

        # linear1 -> ReLU -> linear2, chunked over dim_feedforward so the
        # bias/ReLU/cast epilogue of chunk c overlaps the MXU work of chunk c+1
        # and the live hidden activation is only (TM, chunk).
        # dropout(p=0.0) is identity.
        y = jnp.zeros((tm, d_pad), jnp.float32)
        for c in range(n_chunks):                    # static, small trip count
            lo = c * chunk
            hi = lo + chunk
            h = jnp.dot(x, w1_ref[:, lo:hi], preferred_element_type=jnp.float32)
            h = jnp.maximum(h + b1_ref[:, lo:hi], 0.0).astype(w2_ref.dtype)
            y = y + jnp.dot(h, w2_ref[lo:hi, :], preferred_element_type=jnp.float32)
        y = y + b2_ref[...]                          # b2 pre-cast to f32

        # residual + LayerNorm over the real d_model lanes, in f32.
        z = xf + y
        inv_d = 1.0 / float(d_valid)
        if d_valid == d_pad:
            mean = jnp.sum(z, axis=-1, keepdims=True) * inv_d
            cz = z - mean
        else:
            # Padded lanes of z are exactly zero by construction (zero-padded x,
            # weights and params), but statistics must use the real d_model.
            lane = jax.lax.broadcasted_iota(jnp.int32, z.shape, 1)
            mask = (lane < d_valid).astype(jnp.float32)
            mean = jnp.sum(z * mask, axis=-1, keepdims=True) * inv_d
            cz = (z - mean) * mask
        var = jnp.sum(cz * cz, axis=-1, keepdims=True) * inv_d
        zn = cz * jax.lax.rsqrt(var + 1e-5)
        out = zn * g_ref[...] + beta_ref[...]        # gamma/beta pre-cast to f32

        o_ref[...] = out.astype(out_dtype)

    return kernel


def _build_call(kernel, N, TM, D_pad, dff_pad, out_dtype, vmem_limit, cost,
                single_buffer_weights):
    def resident(shape):
        if single_buffer_weights:
            # Constant index_map -> no re-DMA; Buffered(1) also drops the
            # second (useless) VMEM copy of each resident operand.
            return pl.BlockSpec(shape, lambda i: (0, 0),
                                pipeline_mode=pl.Buffered(1))
        return pl.BlockSpec(shape, lambda i: (0, 0))

    return pl.pallas_call(
        kernel,
        out_shape=jax.ShapeDtypeStruct((N, D_pad), out_dtype),
        grid=(pl.cdiv(N, TM),),
        in_specs=[
            pl.BlockSpec((TM, D_pad), lambda i: (i, 0)),   # x, row-tiled
            resident((D_pad, dff_pad)),                    # w1
            resident((1, dff_pad)),                        # b1 (f32)
            resident((dff_pad, D_pad)),                    # w2
            resident((1, D_pad)),                          # b2 (f32)
            resident((1, D_pad)),                          # layernorm gamma (f32)
            resident((1, D_pad)),                          # layernorm beta (f32)
        ],
        out_specs=pl.BlockSpec((TM, D_pad), lambda i: (i, 0)),
        compiler_params=pltpu.CompilerParams(
            dimension_semantics=("parallel",),
            vmem_limit_bytes=vmem_limit,
        ),
        cost_estimate=cost,
    )


def ffn_layer(tgt, w1, b1, w2, b2, gamma, beta, *, tile_rows=512,
              use_bf16_matmul=False):
    """Fused FFN + residual + LayerNorm.

    tgt: (S, B, D).  w1: (D, dff), b1: (1, dff), w2: (dff, D), b2/gamma/beta: (1, D).
    Returns (S, B, D).

    use_bf16_matmul: cast x/w1/w2 to bf16 for the MXU (accumulation, residual
    and LayerNorm remain f32).  Big win on v5e (no fast f32 MXU path) and a
    solid win on v6e/v7x; off by default to keep exact-f32 reference parity.
    """
    S, B, D = tgt.shape
    dff = w1.shape[1]
    N = S * B

    # Lane-dense padding of the feature axes (multiples of 128).
    # TODO(synk): for non-128-aligned d_model, keep activations in the padded
    # (N, D_pad) layout across decoder layers to avoid the extra pad/slice
    # HBM passes per layer.
    D_pad = _round_up(D, 128)
    dff_pad = _round_up(dff, 128)

    x2d = tgt.reshape(N, D)
    if D_pad != D:
        x2d = jnp.pad(x2d, ((0, 0), (0, D_pad - D)))
        w1 = jnp.pad(w1, ((0, D_pad - D), (0, 0)))
        w2 = jnp.pad(w2, ((0, 0), (0, D_pad - D)))
        b2 = jnp.pad(b2, ((0, 0), (0, D_pad - D)))
        gamma = jnp.pad(gamma, ((0, 0), (0, D_pad - D)))
        beta = jnp.pad(beta, ((0, 0), (0, D_pad - D)))
    if dff_pad != dff:
        w1 = jnp.pad(w1, ((0, 0), (0, dff_pad - dff)))
        b1 = jnp.pad(b1, ((0, 0), (0, dff_pad - dff)))
        w2 = jnp.pad(w2, ((0, dff_pad - dff), (0, 0)))

    # Bias / LN params consumed in f32 inside the kernel — cast once here.
    b1 = b1.astype(jnp.float32)
    b2 = b2.astype(jnp.float32)
    gamma = gamma.astype(jnp.float32)
    beta = beta.astype(jnp.float32)

    if use_bf16_matmul:
        x2d = x2d.astype(jnp.bfloat16)
        w1 = w1.astype(jnp.bfloat16)
        w2 = w2.astype(jnp.bfloat16)

    # dim_feedforward chunk: largest of 512/256/128 that divides dff_pad.
    chunk = 128
    for c in (512, 256):
        if dff_pad % c == 0:
            chunk = c
            break

    # Row tile: aim for >= ~4 grid steps per TensorCore so the x/out DMAs and
    # the LN epilogue are actually pipelined (and v7x's two cores both get
    # work), but never below 128 rows and never above `tile_rows`.
    cores = _num_tensorcores()
    tm_target = _round_up(max(1, -(-N // (4 * cores))), 8)
    TM = max(128, tm_target)
    TM = min(TM, int(tile_rows))
    TM = min(TM, _round_up(N, 8))

    # NOTE: when N % TM != 0 the last block's DMA reads whole-block rows past
    # the end of x2d (Pallas pads partial blocks); those rows' outputs are
    # discarded by the bounded output write, so valid results are unaffected.

    in_b = x2d.dtype.itemsize
    w_b = w1.dtype.itemsize
    out_b = jnp.dtype(tgt.dtype).itemsize

    # VMEM budget: double-buffered x/out tiles, single-buffered weights,
    # one f32 hidden chunk (+ cast copy), f32 accumulator/temporaries, slack.
    vmem_bytes = (
        2 * TM * D_pad * (in_b + out_b)
        + 2 * D_pad * dff_pad * w_b
        + TM * chunk * (4 + w_b)
        + 6 * TM * D_pad * 4
        + (2 << 20)
    )
    vmem_cap = _vmem_capacity_bytes()
    vmem_limit = int(min(max(vmem_bytes, 16 << 20), int(vmem_cap * 0.85)))

    cost = pl.CostEstimate(
        flops=4 * N * D * dff,                   # two matmuls, 2 flops per MAC
        transcendentals=0,
        bytes_accessed=N * D_pad * (in_b + out_b) + 2 * D_pad * dff_pad * w_b,
    )

    kernel = _make_ffn_kernel(D, D_pad, dff_pad, chunk, tgt.dtype)
    args = (x2d, w1, b1, w2, b2, gamma, beta)

    # TODO(synk): for very large models (D>=1024, dff>=4096) stream dff-slices
    # of w1/w2 from HBM via a second "arbitrary" grid axis instead of keeping
    # both weights fully resident (needed to stay within v7x's 64 MiB VMEM).
    try:
        call = _build_call(kernel, N, TM, D_pad, dff_pad, tgt.dtype,
                           vmem_limit, cost, single_buffer_weights=True)
        out2d = jax.block_until_ready(call(*args))
    except Exception:
        # Fallback for JAX versions without pipeline_mode / Buffered(1).
        call = _build_call(kernel, N, TM, D_pad, dff_pad, tgt.dtype,
                           vmem_limit, cost, single_buffer_weights=False)
        out2d = call(*args)

    if D_pad != D:
        out2d = out2d[:, :D]
    return out2d.reshape(S, B, D)


def xavier_uniform(key, fan_in, fan_out, dtype=jnp.float32):
    bound = (6.0 / (fan_in + fan_out)) ** 0.5
    # produced directly in (in, out) layout (transpose of torch's (out, in))
    return jax.random.uniform(key, (fan_in, fan_out), dtype=dtype,
                              minval=-bound, maxval=bound)


if __name__ == "__main__":
    # Small shapes consistent with the decoder FFN: seq=8, batch=2,
    # d_model=32, dim_feedforward=64.  (Real Mask2Former: D=256, dff=2048.)
    S, B, D, DFF = 8, 2, 32, 64

    key = jax.random.PRNGKey(0)
    k_x, k_w1, k_b1, k_w2, k_b2 = jax.random.split(key, 5)

    tgt = jax.random.normal(k_x, (S, B, D), dtype=jnp.float32)

    # Deterministic parameter init (xavier_uniform for 2-D weights, as in
    # FFNLayer._init_weight; small uniform for biases; LN params = 1 / 0).
    w1 = xavier_uniform(k_w1, D, DFF)
    b1 = (jax.random.uniform(k_b1, (1, DFF), minval=-0.01, maxval=0.01)
          .astype(jnp.float32))
    w2 = xavier_uniform(k_w2, DFF, D)
    b2 = (jax.random.uniform(k_b2, (1, D), minval=-0.01, maxval=0.01)
          .astype(jnp.float32))
    gamma = jnp.ones((1, D), jnp.float32)
    beta = jnp.zeros((1, D), jnp.float32)

    out = ffn_layer(tgt, w1, b1, w2, b2, gamma, beta)
    jax.block_until_ready(out)

    # Pure-JAX reference check (same math outside Pallas, unpadded).
    x2d = tgt.reshape(S * B, D)
    h = jnp.maximum(x2d @ w1 + b1, 0.0)
    z = x2d + (h @ w2 + b2)
    mu = jnp.mean(z, axis=-1, keepdims=True)
    var = jnp.mean((z - mu) ** 2, axis=-1, keepdims=True)
    ref = ((z - mu) * jax.lax.rsqrt(var + 1e-5)) * gamma + beta
    ref = ref.reshape(S, B, D)

    assert jnp.allclose(out, ref, atol=1e-5, rtol=1e-5), "mismatch vs reference"
    print("KERNEL_OK")
</pallas_src>

<mosaic_0001>
module attributes {stable_mosaic.version = 11 : i64} {
  func.func @kernel(%arg0: i32, %arg1: memref<16x128xf32, #tpu.memory_space<vmem>>, %arg2: memref<128x128xf32, #tpu.memory_space<vmem>>, %arg3: memref<1x128xf32, #tpu.memory_space<vmem>>, %arg4: memref<128x128xf32, #tpu.memory_space<vmem>>, %arg5: memref<1x128xf32, #tpu.memory_space<vmem>>, %arg6: memref<1x128xf32, #tpu.memory_space<vmem>>, %arg7: memref<1x128xf32, #tpu.memory_space<vmem>>, %arg8: memref<16x128xf32, #tpu.memory_space<vmem>>) attributes {dimension_semantics = [#tpu.dimension_semantics<parallel>], iteration_bounds = array<i64: 1>, scalar_prefetch = 0 : i64, scratch_operands = 0 : i64, tpu.core_type = #tpu.core_type<tc>, window_params = [{transform_indices = @transform_0, window_bounds = array<i64: 16, 128>}, {pipeline_mode = #tpu.pipeline_mode<synchronous>, transform_indices = @transform_1, window_bounds = array<i64: 128, 128>}, {pipeline_mode = #tpu.pipeline_mode<synchronous>, transform_indices = @transform_2, window_bounds = array<i64: 1, 128>}, {pipeline_mode = #tpu.pipeline_mode<synchronous>, transform_indices = @transform_3, window_bounds = array<i64: 128, 128>}, {pipeline_mode = #tpu.pipeline_mode<synchronous>, transform_indices = @transform_4, window_bounds = array<i64: 1, 128>}, {pipeline_mode = #tpu.pipeline_mode<synchronous>, transform_indices = @transform_5, window_bounds = array<i64: 1, 128>}, {pipeline_mode = #tpu.pipeline_mode<synchronous>, transform_indices = @transform_6, window_bounds = array<i64: 1, 128>}, {transform_indices = @transform_7, window_bounds = array<i64: 16, 128>}]} {
    %c0 = arith.constant 0 : index
    %c0_0 = arith.constant 0 : index
    %0 = vector.load %arg1[%c0, %c0_0] : memref<16x128xf32, #tpu.memory_space<vmem>>, vector<16x128xf32>
    %cst = arith.constant 0.000000e+00 : f32
    %1 = vector.broadcast %cst : f32 to vector<16x128xf32>
    %c0_1 = arith.constant 0 : index
    %c0_2 = arith.constant 0 : index
    %2 = vector.load %arg2[%c0_1, %c0_2] : memref<128x128xf32, #tpu.memory_space<vmem>>, vector<128x128xf32>
    %cst_3 = arith.constant dense<0.000000e+00> : vector<16x128xf32>
    %3 = tpu.matmul %0, %2, %cst_3 {dimension_numbers = #tpu.dot_dimension_numbers<[1], [0], [0], [1], [0, 0, 1, 1], [], []>} : vector<16x128xf32>, vector<128x128xf32>, vector<16x128xf32> -> vector<16x128xf32>
    %c0_4 = arith.constant 0 : index
    %c0_5 = arith.constant 0 : index
    %4 = vector.load %arg3[%c0_4, %c0_5] : memref<1x128xf32, #tpu.memory_space<vmem>>, vector<1x128xf32>
    %5 = vector.broadcast %4 : vector<1x128xf32> to vector<16x128xf32>
    %6 = arith.addf %3, %5 : vector<16x128xf32>
    %cst_6 = arith.constant 0.000000e+00 : f32
    %7 = vector.broadcast %cst_6 : f32 to vector<16x128xf32>
    %8 = arith.maximumf %6, %7 : vector<16x128xf32>
    %c0_7 = arith.constant 0 : index
    %c0_8 = arith.constant 0 : index
    %9 = vector.load %arg4[%c0_7, %c0_8] : memref<128x128xf32, #tpu.memory_space<vmem>>, vector<128x128xf32>
    %cst_9 = arith.constant dense<0.000000e+00> : vector<16x128xf32>
    %10 = tpu.matmul %8, %9, %cst_9 {dimension_numbers = #tpu.dot_dimension_numbers<[1], [0], [0], [1], [0, 0, 1, 1], [], []>} : vector<16x128xf32>, vector<128x128xf32>, vector<16x128xf32> -> vector<16x128xf32>
    %11 = arith.addf %1, %10 : vector<16x128xf32>
    %c0_10 = arith.constant 0 : index
    %c0_11 = arith.constant 0 : index
    %12 = vector.load %arg5[%c0_10, %c0_11] : memref<1x128xf32, #tpu.memory_space<vmem>>, vector<1x128xf32>
    %13 = vector.broadcast %12 : vector<1x128xf32> to vector<16x128xf32>
    %14 = arith.addf %11, %13 : vector<16x128xf32>
    %15 = arith.addf %0, %14 : vector<16x128xf32>
    %16 = tpu.iota {dimensions = array<i32: 1>} : vector<16x128xi32>
    %c32_i32 = arith.constant 32 : i32
    %17 = vector.broadcast %c32_i32 : i32 to vector<16x128xi32>
    %18 = arith.cmpi slt, %16, %17 : vector<16x128xi32>
    %19 = arith.extui %18 : vector<16x128xi1> to vector<16x128xi32>
    %20 = arith.sitofp %19 : vector<16x128xi32> to vector<16x128xf32>
    %21 = arith.mulf %15, %20 : vector<16x128xf32>
    %cst_12 = arith.constant dense<0.000000e+00> : vector<16xf32>
    %22 = vector.multi_reduction <add>, %21, %cst_12 [1] : vector<16x128xf32> to vector<16xf32>
    %23 = vector.shape_cast %22 : vector<16xf32> to vector<16x1xf32>
    %cst_13 = arith.constant 3.125000e-02 : f32
    %24 = vector.broadcast %cst_13 : f32 to vector<16x1xf32>
    %25 = arith.mulf %23, %24 : vector<16x1xf32>
    %26 = vector.broadcast %25 : vector<16x1xf32> to vector<16x128xf32>
    %27 = arith.subf %15, %26 : vector<16x128xf32>
    %28 = arith.mulf %27, %20 : vector<16x128xf32>
    %29 = arith.mulf %28, %28 : vector<16x128xf32>
    %cst_14 = arith.constant dense<0.000000e+00> : vector<16xf32>
    %30 = vector.multi_reduction <add>, %29, %cst_14 [1] : vector<16x128xf32> to vector<16xf32>
    %31 = vector.shape_cast %30 : vector<16xf32> to vector<16x1xf32>
    %cst_15 = arith.constant 3.125000e-02 : f32
    %32 = vector.broadcast %cst_15 : f32 to vector<16x1xf32>
    %33 = arith.mulf %31, %32 : vector<16x1xf32>
    %cst_16 = arith.constant 9.99999974E-6 : f32
    %34 = vector.broadcast %cst_16 : f32 to vector<16x1xf32>
    %35 = arith.addf %33, %34 : vector<16x1xf32>
    %36 = math.rsqrt %35 : vector<16x1xf32>
    %37 = vector.broadcast %36 : vector<16x1xf32> to vector<16x128xf32>
    %38 = arith.mulf %28, %37 : vector<16x128xf32>
    %c0_17 = arith.constant 0 : index
    %c0_18 = arith.constant 0 : index
    %39 = vector.load %arg6[%c0_17, %c0_18] : memref<1x128xf32, #tpu.memory_space<vmem>>, vector<1x128xf32>
    %40 = vector.broadcast %39 : vector<1x128xf32> to vector<16x128xf32>
    %41 = arith.mulf %38, %40 : vector<16x128xf32>
    %c0_19 = arith.constant 0 : index
    %c0_20 = arith.constant 0 : index
    %42 = vector.load %arg7[%c0_19, %c0_20] : memref<1x128xf32, #tpu.memory_space<vmem>>, vector<1x128xf32>
    %43 = vector.broadcast %42 : vector<1x128xf32> to vector<16x128xf32>
    %44 = arith.addf %41, %43 : vector<16x128xf32>
    %c0_21 = arith.constant 0 : index
    %c0_22 = arith.constant 0 : index
    %45 = vector.load %arg8[%c0_21, %c0_22] : memref<16x128xf32, #tpu.memory_space<vmem>>, vector<16x128xf32>
    tpu.vector_store %arg8[%c0_21, %c0_22], %44 {strides = array<i32>} : memref<16x128xf32, #tpu.memory_space<vmem>>, vector<16x128xf32>,
    return
  }
  func.func @transform_0(%arg0: i32) -> (i32, i32) {
    %c0_i32 = arith.constant 0 : i32
    %c0_i32_0 = arith.constant 0 : i32
    return %arg0, %c0_i32 : i32, i32
  }
  func.func @transform_1(%arg0: i32) -> (i32, i32) {
    %c0_i32 = arith.constant 0 : i32
    %c0_i32_0 = arith.constant 0 : i32
    %c0_i32_1 = arith.constant 0 : i32
    return %c0_i32, %c0_i32_0 : i32, i32
  }
  func.func @transform_2(%arg0: i32) -> (i32, i32) {
    %c0_i32 = arith.constant 0 : i32
    %c0_i32_0 = arith.constant 0 : i32
    %c0_i32_1 = arith.constant 0 : i32
    return %c0_i32, %c0_i32_0 : i32, i32
  }
  func.func @transform_3(%arg0: i32) -> (i32, i32) {
    %c0_i32 = arith.constant 0 : i32
    %c0_i32_0 = arith.constant 0 : i32
    %c0_i32_1 = arith.constant 0 : i32
    return %c0_i32, %c0_i32_0 : i32, i32
  }
  func.func @transform_4(%arg0: i32) -> (i32, i32) {
    %c0_i32 = arith.constant 0 : i32
    %c0_i32_0 = arith.constant 0 : i32
    %c0_i32_1 = arith.constant 0 : i32
    return %c0_i32, %c0_i32_0 : i32, i32
  }
  func.func @transform_5(%arg0: i32) -> (i32, i32) {
    %c0_i32 = arith.constant 0 : i32
    %c0_i32_0 = arith.constant 0 : i32
    %c0_i32_1 = arith.constant 0 : i32
    return %c0_i32, %c0_i32_0 : i32, i32
  }
  func.func @transform_6(%arg0: i32) -> (i32, i32) {
    %c0_i32 = arith.constant 0 : i32
    %c0_i32_0 = arith.constant 0 : i32
    %c0_i32_1 = arith.constant 0 : i32
    return %c0_i32, %c0_i32_0 : i32, i32
  }
  func.func @transform_7(%arg0: i32) -> (i32, i32) {
    %c0_i32 = arith.constant 0 : i32
    %c0_i32_0 = arith.constant 0 : i32
    return %arg0, %c0_i32 : i32, i32
  }
}

module attributes {stable_mosaic.version = 11 : i64} {
  func.func @kernel(%arg0: i32, %arg1: memref<16x128xf32, #tpu.memory_space<vmem>>, %arg2: memref<128x128xf32, #tpu.memory_space<vmem>>, %arg3: memref<1x128xf32, #tpu.memory_space<vmem>>, %arg4: memref<128x128xf32, #tpu.memory_space<vmem>>, %arg5: memref<1x128xf32, #tpu.memory_space<vmem>>, %arg6: memref<1x128xf32, #tpu.memory_space<vmem>>, %arg7: memref<1x128xf32, #tpu.memory_space<vmem>>, %arg8: memref<16x128xf32, #tpu.memory_space<vmem>>) attributes {dimension_semantics = [#tpu.dimension_semantics<parallel>], iteration_bounds = array<i64: 1>, scalar_prefetch = 0 : i64, scratch_operands = 0 : i64, tpu.core_type = #tpu.core_type<tc>, window_params = [{transform_indices = @transform_0, window_bounds = array<i64: 16, 128>}, {pipeline_mode = #tpu.pipeline_mode<synchronous>, transform_indices = @transform_1, window_bounds = array<i64: 128, 128>}, {pipeline_mode = #tpu.pipeline_mode<synchronous>, transform_indices = @transform_2, window_bounds = array<i64: 1, 128>}, {pipeline_mode = #tpu.pipeline_mode<synchronous>, transform_indices = @transform_3, window_bounds = array<i64: 128, 128>}, {pipeline_mode = #tpu.pipeline_mode<synchronous>, transform_indices = @transform_4, window_bounds = array<i64: 1, 128>}, {pipeline_mode = #tpu.pipeline_mode<synchronous>, transform_indices = @transform_5, window_bounds = array<i64: 1, 128>}, {pipeline_mode = #tpu.pipeline_mode<synchronous>, transform_indices = @transform_6, window_bounds = array<i64: 1, 128>}, {transform_indices = @transform_7, window_bounds = array<i64: 16, 128>}]} {
    %c0 = arith.constant 0 : index
    %c0_0 = arith.constant 0 : index
    %0 = vector.load %arg1[%c0, %c0_0] : memref<16x128xf32, #tpu.memory_space<vmem>>, vector<16x128xf32>
    %cst = arith.constant 0.000000e+00 : f32
    %1 = vector.broadcast %cst : f32 to vector<16x128xf32>
    %c0_1 = arith.constant 0 : index
    %c0_2 = arith.constant 0 : index
    %2 = vector.load %arg2[%c0_1, %c0_2] : memref<128x128xf32, #tpu.memory_space<vmem>>, vector<128x128xf32>
    %cst_3 = arith.constant dense<0.000000e+00> : vector<16x128xf32>
    %3 = tpu.matmul %0, %2, %cst_3 {dimension_numbers = #tpu.dot_dimension_numbers<[1], [0], [0], [1], [0, 0, 1, 1], [], []>} : vector<16x128xf32>, vector<128x128xf32>, vector<16x128xf32> -> vector<16x128xf32>
    %c0_4 = arith.constant 0 : index
    %c0_5 = arith.constant 0 : index
    %4 = vector.load %arg3[%c0_4, %c0_5] : memref<1x128xf32, #tpu.memory_space<vmem>>, vector<1x128xf32>
    %5 = vector.broadcast %4 : vector<1x128xf32> to vector<16x128xf32>
    %6 = arith.addf %3, %5 : vector<16x128xf32>
    %cst_6 = arith.constant 0.000000e+00 : f32
    %7 = vector.broadcast %cst_6 : f32 to vector<16x128xf32>
    %8 = arith.maximumf %6, %7 : vector<16x128xf32>
    %c0_7 = arith.constant 0 : index
    %c0_8 = arith.constant 0 : index
    %9 = vector.load %arg4[%c0_7, %c0_8] : memref<128x128xf32, #tpu.memory_space<vmem>>, vector<128x128xf32>
    %cst_9 = arith.constant dense<0.000000e+00> : vector<16x128xf32>
    %10 = tpu.matmul %8, %9, %cst_9 {dimension_numbers = #tpu.dot_dimension_numbers<[1], [0], [0], [1], [0, 0, 1, 1], [], []>} : vector<16x128xf32>, vector<128x128xf32>, vector<16x128xf32> -> vector<16x128xf32>
    %11 = arith.addf %1, %10 : vector<16x128xf32>
    %c0_10 = arith.constant 0 : index
    %c0_11 = arith.constant 0 : index
    %12 = vector.load %arg5[%c0_10, %c0_11] : memref<1x128xf32, #tpu.memory_space<vmem>>, vector<1x128xf32>
    %13 = vector.broadcast %12 : vector<1x128xf32> to vector<16x128xf32>
    %14 = arith.addf %11, %13 : vector<16x128xf32>
    %15 = arith.addf %0, %14 : vector<16x128xf32>
    %16 = tpu.iota {dimensions = array<i32: 1>} : vector<16x128xi32>
    %c32_i32 = arith.constant 32 : i32
    %17 = vector.broadcast %c32_i32 : i32 to vector<16x128xi32>
    %18 = arith.cmpi slt, %16, %17 : vector<16x128xi32>
    %19 = arith.extui %18 : vector<16x128xi1> to vector<16x128xi32>
    %20 = arith.sitofp %19 : vector<16x128xi32> to vector<16x128xf32>
    %21 = arith.mulf %15, %20 : vector<16x128xf32>
    %cst_12 = arith.constant dense<0.000000e+00> : vector<16xf32>
    %22 = vector.multi_reduction <add>, %21, %cst_12 [1] : vector<16x128xf32> to vector<16xf32>
    %23 = vector.shape_cast %22 : vector<16xf32> to vector<16x1xf32>
    %cst_13 = arith.constant 3.125000e-02 : f32
    %24 = vector.broadcast %cst_13 : f32 to vector<16x1xf32>
    %25 = arith.mulf %23, %24 : vector<16x1xf32>
    %26 = vector.broadcast %25 : vector<16x1xf32> to vector<16x128xf32>
    %27 = arith.subf %15, %26 : vector<16x128xf32>
    %28 = arith.mulf %27, %20 : vector<16x128xf32>
    %29 = arith.mulf %28, %28 : vector<16x128xf32>
    %cst_14 = arith.constant dense<0.000000e+00> : vector<16xf32>
    %30 = vector.multi_reduction <add>, %29, %cst_14 [1] : vector<16x128xf32> to vector<16xf32>
    %31 = vector.shape_cast %30 : vector<16xf32> to vector<16x1xf32>
    %cst_15 = arith.constant 3.125000e-02 : f32
    %32 = vector.broadcast %cst_15 : f32 to vector<16x1xf32>
    %33 = arith.mulf %31, %32 : vector<16x1xf32>
    %cst_16 = arith.constant 9.99999974E-6 : f32
    %34 = vector.broadcast %cst_16 : f32 to vector<16x1xf32>
    %35 = arith.addf %33, %34 : vector<16x1xf32>
    %36 = math.rsqrt %35 : vector<16x1xf32>
    %37 = vector.broadcast %36 : vector<16x1xf32> to vector<16x128xf32>
    %38 = arith.mulf %28, %37 : vector<16x128xf32>
    %c0_17 = arith.constant 0 : index
    %c0_18 = arith.constant 0 : index
    %39 = vector.load %arg6[%c0_17, %c0_18] : memref<1x128xf32, #tpu.memory_space<vmem>>, vector<1x128xf32>
    %40 = vector.broadcast %39 : vector<1x128xf32> to vector<16x128xf32>
    %41 = arith.mulf %38, %40 : vector<16x128xf32>
    %c0_19 = arith.constant 0 : index
    %c0_20 = arith.constant 0 : index
    %42 = vector.load %arg7[%c0_19, %c0_20] : memref<1x128xf32, #tpu.memory_space<vmem>>, vector<1x128xf32>
    %43 = vector.broadcast %42 : vector<1x128xf32> to vector<16x128xf32>
    %44 = arith.addf %41, %43 : vector<16x128xf32>
    %c0_21 = arith.constant 0 : index
    %c0_22 = arith.constant 0 : index
    %45 = vector.load %arg8[%c0_21, %c0_22] : memref<16x128xf32, #tpu.memory_space<vmem>>, vector<16x128xf32>
    tpu.vector_store %arg8[%c0_21, %c0_22], %44 {strides = array<i32>} : memref<16x128xf32, #tpu.memory_space<vmem>>, vector<16x128xf32>,
    return
  }
  func.func @transform_0(%arg0: i32) -> (i32, i32) {
    %c0_i32 = arith.constant 0 : i32
    %c0_i32_0 = arith.constant 0 : i32
    return %arg0, %c0_i32 : i32, i32
  }
  func.func @transform_1(%arg0: i32) -> (i32, i32) {
    %c0_i32 = arith.constant 0 : i32
    %c0_i32_0 = arith.constant 0 : i32
    %c0_i32_1 = arith.constant 0 : i32
    return %c0_i32, %c0_i32_0 : i32, i32
  }
  func.func @transform_2(%arg0: i32) -> (i32, i32) {
    %c0_i32 = arith.constant 0 : i32
    %c0_i32_0 = arith.constant 0 : i32
    %c0_i32_1 = arith.constant 0 : i32
    return %c0_i32, %c0_i32_0 : i32, i32
  }
  func.func @transform_3(%arg0: i32) -> (i32, i32) {
    %c0_i32 = arith.constant 0 : i32
    %c0_i32_0 = arith.constant 0 : i32
    %c0_i32_1 = arith.constant 0 : i32
    return %c0_i32, %c0_i32_0 : i32, i32
  }
  func.func @transform_4(%arg0: i32) -> (i32, i32) {
    %c0_i32 = arith.constant 0 : i32
    %c0_i32_0 = arith.constant 0 : i32
    %c0_i32_1 = arith.constant 0 : i32
    return %c0_i32, %c0_i32_0 : i32, i32
  }
  func.func @transform_5(%arg0: i32) -> (i32, i32) {
    %c0_i32 = arith.constant 0 : i32
    %c0_i32_0 = arith.constant 0 : i32
    %c0_i32_1 = arith.constant 0 : i32
    return %c0_i32, %c0_i32_0 : i32, i32
  }
  func.func @transform_6(%arg0: i32) -> (i32, i32) {
    %c0_i32 = arith.constant 0 : i32
    %c0_i32_0 = arith.constant 0 : i32
    %c0_i32_1 = arith.constant 0 : i32
    return %c0_i32, %c0_i32_0 : i32, i32
  }
  func.func @transform_7(%arg0: i32) -> (i32, i32) {
    %c0_i32 = arith.constant 0 : i32
    %c0_i32_0 = arith.constant 0 : i32
    return %arg0, %c0_i32 : i32, i32
  }
}

</mosaic_0001>

<bundles_post_ra>
// kernel: tpu_custom_call.1
= control target key start
LH: loop header
LB: loop body
LE: loop exit
PB: predicated region body
PF: predicated region fallthrough
CT: control target
= control target key end

     0   :  { %12 = vsyncpa [#allocation3], 0  ;;  %s634_s0 = inlined_call_operand.hbm [shape: f32[16,128], index: 0, kind: input, shape index: {}]   ;;  %s635_s1 = inlined_call_operand.hbm [shape: f32[128,128], index: 1, kind: input, shape index: {}]   ;;  %s636_s2 = inlined_call_operand.vmem [shape: f32[1,128], index: 2, kind: input, shape index: {}]   ;;  %s637_s3 = inlined_call_operand.hbm [shape: f32[128,128], index: 3, kind: input, shape index: {}]   ;;  %s638_s4 = inlined_call_operand.vmem [shape: f32[1,128], index: 4, kind: input, shape index: {}]   ;;  %s639_s5 = inlined_call_operand.vmem [shape: f32[1,128], index: 5, kind: input, shape index: {}]   ;;  %s640_s6 = inlined_call_operand.vmem [shape: f32[1,128], index: 6, kind: input, shape index: {}]   ;;  %s641_s7 = inlined_call_operand.hbm [shape: f32[16,128], index: 7, kind: output, shape index: {}]  }
   0x1   :  { %13 = vsyncpa [#allocation6], 0 }
   0x2   :  { %14 = vsyncpa [#allocation4], 0  ;;  %s547_s24 = smov [#allocation5]   ;;  %s548_s26 = smov [#allocation2]  }
   0x3   :  { %s32_s25 = sshll.u32 %s547_s24, 4  ;;  %s20_s27 = sshll.u32 %s548_s26, 4  ;;  %s33_s25 = int_to_ptr.vmem [resolvable:$true] %s32_s25  ;;  %s21_s27 = int_to_ptr.vmem [resolvable:$true] %s20_s27 }
   0x4   :  { %s469_s28 = scalar_lea.vmem %s33_s25, 2048  ;;  %p474_p1 = scmp.lt.s32.totalorder %s33_s25, %s33_s25 }
   0x5   :  { %p470_p0 = scmp.ne.s32.totalorder %s33_s25, %s469_s28  ;;  %p475_p2 = scmp.lt.s32.totalorder %s469_s28, %s469_s28 }
   0x7   :  { %p476_p3 = por %p475_p2, %p474_p1 }
   0x9   :  { %p477_p4 = pnand %p476_p3, %p470_p0 }
   0xb   :  { %480 = shalt.err (!%p477_p4)
}
   0xc   :  { %s549_s29 = smov 128   ;;  %s550_s30 = smov 8  }
   0xd   :  { %38 = dma.hbm_to_vmem [thread:$0]  %s635_s1, 2048, %s33_s25, [#allocation6], %s549_s29, %s549_s29, %s550_s30  }
   0xe   :  { %s489_s10 = scalar_lea.vmem %s21_s27, 256  ;;  %p494_p6 = scmp.lt.s32.totalorder %s21_s27, %s21_s27 }
   0xf   :  { %p490_p5 = scmp.ne.s32.totalorder %s21_s27, %s489_s10  ;;  %p495_p7 = scmp.lt.s32.totalorder %s489_s10, %s489_s10 }
  0x11   :  { %p496_p8 = por %p495_p7, %p494_p6 }
  0x13   :  { %p497_p9 = pnand %p496_p8, %p490_p5 }
  0x15   :  { %500 = shalt.err (!%p497_p9)
}
  0x16   :  { %26 = dma.hbm_to_vmem [thread:$0]  %s634_s0, 256, %s21_s27, [#allocation3], %s549_s29, %s549_s29, %s550_s30  }
  0x17   :  { %s551_s13 = smov [#allocation7]  }
  0x18   :  { %s46_s14 = sshll.u32 %s551_s13, 4  ;;  %s47_s14 = int_to_ptr.vmem [resolvable:$true] %s46_s14 }
  0x19   :  { %s509_s15 = scalar_lea.vmem %s47_s14, 2048  ;;  %p514_p11 = scmp.lt.s32.totalorder %s47_s14, %s47_s14 }
  0x1a   :  { %p510_p10 = scmp.ne.s32.totalorder %s47_s14, %s509_s15  ;;  %p515_p12 = scmp.lt.s32.totalorder %s509_s15, %s509_s15 }
  0x1c   :  { %p516_p13 = por %p515_p12, %p514_p11 }
  0x1e   :  { %p517_p0 = pnand %p516_p13, %p510_p10 }
  0x20   :  { %520 = shalt.err (!%p517_p0)
}
  0x21   :  { %52 = dma.hbm_to_vmem [thread:$0]  %s637_s3, 2048, %s47_s14, [#allocation6], %s549_s29, %s549_s29, %s550_s30  }
  0x22   :  { %541 = dma.done.wait [#allocation3], 256  }
  0x23   :  { %542 = vsyncadd [#allocation3], 4294967040 }
  0x24   :  { %543 = dma.done.wait [#allocation6], 4096  }
  0x25   :  { %544 = vsyncadd [#allocation6], 4294963200  ;;  %v85_v0 = vld [vmem:[#allocation5 + $0x78] sm:$0xff]  ;;  %v84_v1 = vld [vmem:[#allocation5 + $0x70] sm:$0xff]  ;;  %v270_v41 = vlaneseq  ;;  %v552_v49 = vmov 0.0   ;;  %s553_s21 = smov [#allocation8]  }
  0x26   :  { %380 = vmatprep.subr.mxu0 %v85_v0  ;;  %v83_v2 = vld [vmem:[#allocation5 + $0x68] sm:$0xff]  ;;  %v82_v3 = vld [vmem:[#allocation5 + $0x60] sm:$0xff]  ;;  %v612_v4 = vld [vmem:[#allocation2] sm:$0xff]  ;;  %s326_s22 = sshll.u32 %s553_s21, 4  ;;  %s327_s22 = int_to_ptr.vmem [resolvable:$true] %s326_s22 }
  0x27   :  { %381 = vmatpush3.msra.mxu0 %v85_v0  ;;  %v81_v5 = vld [vmem:[#allocation5 + $0x58] sm:$0xff]  ;;  %412 = vmatprep.mubr.f32.mxu0 %v612_v4  ;;  %v184_v7 = vld [vmem:[#allocation7 + $0x70] sm:$0xff]  ;;  %v183_v9 = vld [vmem:[#allocation7 + $0x68] sm:$0xff]  ;;  %v271_v42 = vand.u32 127, %v270_v41  ;;  %s521_s23 = scalar_lea.vmem %s327_s22, 256  ;;  %p526_p2 = scmp.lt.s32.totalorder %s327_s22, %s327_s22 }
  0x28   :  { %382 = vmatprep.subr.mxu0 %v84_v1  ;;  %v185_v6 = vld [vmem:[#allocation7 + $0x78] sm:$0xff]  ;;  %v80_v8 = vld [vmem:[#allocation5 + $0x50] sm:$0xff]  ;;  %v79_v10 = vld [vmem:[#allocation5 + $0x48] sm:$0xff]  ;;  %p522_p1 = scmp.ne.s32.totalorder %s327_s22, %s521_s23  ;;  %p527_p3 = scmp.lt.s32.totalorder %s521_s23, %s521_s23 }
  0x29   :  { %383 = vmatpush3.msra.mxu0 %v84_v1  ;;  %415 = vmatprep.subr.mxu1 %v185_v6  ;;  %v182_v11 = vld [vmem:[#allocation7 + $0x60] sm:$0xff]  ;;  %v181_v13 = vld [vmem:[#allocation7 + $0x58] sm:$0xff]  ;;  %v180_v15 = vld [vmem:[#allocation7 + $0x50] sm:$0xff]  ;;  %vm272_vm0 = vcmp.lt.s32.totalorder %v271_v42, 32 }
  0x2a   :  { %384 = vmatprep.subr.mxu0 %v83_v2  ;;  %416 = vmatpush3.msra.mxu1 %v185_v6  ;;  %v78_v12 = vld [vmem:[#allocation5 + $0x40] sm:$0xff]  ;;  %v77_v14 = vld [vmem:[#allocation5 + $0x38] sm:$0xff]  ;;  %v76_v16 = vld [vmem:[#allocation5 + $0x30] sm:$0xff]  ;;  %v341_v50 = vsel %vm272_vm0, 1.0, %v552_v49  ;;  %p528_p4 = por %p527_p3, %p526_p2 }
  0x2b   :  { %385 = vmatpush3.msra.mxu0 %v83_v2  ;;  %417 = vmatprep.subr.mxu1 %v184_v7  ;;  %v179_v17 = vld [vmem:[#allocation7 + $0x48] sm:$0xff]  ;;  %v178_v19 = vld [vmem:[#allocation7 + $0x40] sm:$0xff]  ;;  %v177_v21 = vld [vmem:[#allocation7 + $0x38] sm:$0xff] }
  0x2c   :  { %386 = vmatprep.subr.mxu0 %v82_v3  ;;  %418 = vmatpush3.msra.mxu1 %v184_v7  ;;  %v75_v18 = vld [vmem:[#allocation5 + $0x28] sm:$0xff]  ;;  %v74_v20 = vld [vmem:[#allocation5 + $0x20] sm:$0xff]  ;;  %v73_v22 = vld [vmem:[#allocation5 + $0x18] sm:$0xff]  ;;  %p529_p5 = pnand %p528_p4, %p522_p1 }
  0x2d   :  { %387 = vmatpush3.msra.mxu0 %v82_v3  ;;  %419 = vmatprep.subr.mxu1 %v183_v9  ;;  %v176_v23 = vld [vmem:[#allocation7 + $0x30] sm:$0xff]  ;;  %v175_v25 = vld [vmem:[#allocation7 + $0x28] sm:$0xff]  ;;  %v174_v27 = vld [vmem:[#allocation7 + $0x20] sm:$0xff] }
  0x2e   :  { %388 = vmatprep.subr.mxu0 %v81_v5  ;;  %420 = vmatpush3.msra.mxu1 %v183_v9  ;;  %v72_v24 = vld [vmem:[#allocation5 + $0x10] sm:$0xff]  ;;  %v71_v26 = vld [vmem:[#allocation5 + $0x8] sm:$0xff]  ;;  %v70_v28 = vld [vmem:[#allocation5] sm:$0xff] }
  0x2f   :  { %389 = vmatpush3.msra.mxu0 %v81_v5  ;;  %421 = vmatprep.subr.mxu1 %v182_v11  ;;  %v69_v29 = vld [vmem:[#allocation2 + $0x8] sm:$0xff]  ;;  %v172_v31 = vld [vmem:[#allocation7 + $0x10] sm:$0xff]  ;;  %v171_v32 = vld [vmem:[#allocation7 + $0x8] sm:$0xff] }
  0x30   :  { %390 = vmatprep.subr.mxu0 %v80_v8  ;;  %422 = vmatpush3.msra.mxu1 %v182_v11  ;;  %v173_v30 = vld [vmem:[#allocation7 + $0x18] sm:$0xff]  ;;  %v170_v33 = vld [vmem:[#allocation7] sm:$0xff]  ;;  %v339_v34 = vld [vmem:[%s636_s2] ss:$0 sm:$0xff] }
  0x31   :  { %391 = vmatpush3.msra.mxu0 %v80_v8  ;;  %423 = vmatprep.subr.mxu1 %v181_v13  ;;  %v340_v44 = vld [vmem:[%s638_s4] ss:$0 sm:$0xff] }
  0x32   :  { %392 = vmatprep.subr.mxu0 %v79_v10  ;;  %424 = vmatpush3.msra.mxu1 %v181_v13  ;;  %v342_v7 = vld [vmem:[%s639_s5] ss:$0 sm:$0xff] }
  0x33   :  { %393 = vmatpush3.msra.mxu0 %v79_v10  ;;  %425 = vmatprep.subr.mxu1 %v180_v15  ;;  %v343_v9 = vld [vmem:[%s640_s6] ss:$0 sm:$0xff] }
  0x34   :  { %394 = vmatprep.subr.mxu0 %v78_v12  ;;  %426 = vmatpush3.msra.mxu1 %v180_v15 }
  0x35   :  { %395 = vmatpush3.msra.mxu0 %v78_v12  ;;  %427 = vmatprep.subr.mxu1 %v179_v17 }
  0x36   :  { %396 = vmatprep.subr.mxu0 %v77_v14  ;;  %428 = vmatpush3.msra.mxu1 %v179_v17 }
  0x37   :  { %397 = vmatpush3.msra.mxu0 %v77_v14  ;;  %429 = vmatprep.subr.mxu1 %v178_v19 }
  0x38   :  { %398 = vmatprep.subr.mxu0 %v76_v16  ;;  %430 = vmatpush3.msra.mxu1 %v178_v19 }
  0x39   :  { %399 = vmatpush3.msra.mxu0 %v76_v16  ;;  %431 = vmatprep.subr.mxu1 %v177_v21 }
  0x3a   :  { %400 = vmatprep.subr.mxu0 %v75_v18  ;;  %432 = vmatpush3.msra.mxu1 %v177_v21 }
  0x3b   :  { %401 = vmatpush3.msra.mxu0 %v75_v18  ;;  %433 = vmatprep.subr.mxu1 %v176_v23 }
  0x3c   :  { %402 = vmatprep.subr.mxu0 %v74_v20  ;;  %434 = vmatpush3.msra.mxu1 %v176_v23 }
  0x3d   :  { %403 = vmatpush3.msra.mxu0 %v74_v20  ;;  %435 = vmatprep.subr.mxu1 %v175_v25 }
  0x3e   :  { %404 = vmatprep.subr.mxu0 %v73_v22  ;;  %436 = vmatpush3.msra.mxu1 %v175_v25 }
  0x3f   :  { %405 = vmatpush3.msra.mxu0 %v73_v22  ;;  %437 = vmatprep.subr.mxu1 %v174_v27 }
  0x40   :  { %406 = vmatprep.subr.mxu0 %v72_v24  ;;  %438 = vmatpush3.msra.mxu1 %v174_v27 }
  0x41   :  { %407 = vmatpush3.msra.mxu0 %v72_v24  ;;  %439 = vmatprep.subr.mxu1 %v173_v30 }
  0x42   :  { %408 = vmatprep.subr.mxu0 %v71_v26  ;;  %440 = vmatpush3.msra.mxu1 %v173_v30 }
  0x43   :  { %409 = vmatpush3.msra.mxu0 %v71_v26  ;;  %441 = vmatprep.subr.mxu1 %v172_v31 }
  0x44   :  { %410 = vmatprep.subr.mxu0 %v70_v28  ;;  %442 = vmatpush3.msra.mxu1 %v172_v31 }
  0x45   :  { %411 = vmatpush3.msra.mxu0 %v70_v28  ;;  %443 = vmatprep.subr.mxu1 %v171_v32 }
  0x46   :  { %413 = vmatmul.mubr.f32.vlgmr.msra.gmra.mxu0 %v69_v29  ;;  %444 = vmatpush3.msra.mxu1 %v171_v32 }
  0x47   :  { %445 = vmatprep.subr.mxu1 %v170_v33 }
  0x48   :  { %446 = vmatpush3.msra.mxu1 %v170_v33 }
 0x106   :  { %v414_v35 = vpop.f32.mrf.mxu0 }
 0x107   :  { %v165_v36 = vadd.f32 %v414_v35, %v339_v34 }
 0x108   :  { %v159_v37 = vpop.f32.mrf.mxu0 }
 0x109   :  { %v160_v38 = vadd.f32 %v339_v34, %v159_v37  ;;  %v169_v40 = vmax.f32 %v165_v36, 0.0 }
 0x10b   :  { %v168_v39 = vmax.f32 %v160_v38, 0.0 }
 0x10d   :  { %447 = vmatprep.mubr.f32.mxu1 %v168_v39 }
 0x10e   :  { %448 = vmatmul.mubr.f32.vlgmr.msra.gmra.mxu1 %v169_v40 }
 0x1ce   :  { %v449_v43 = vpop.f32.mrf.mxu1 }
 0x1cf   :  { %v265_v46 = vadd.f32 %v449_v43, %v340_v44 }
 0x1d0   :  { %v259_v45 = vpop.f32.mrf.mxu1 }
 0x1d1   :  { %v260_v47 = vadd.f32 %v340_v44, %v259_v45  ;;  %v269_v51 = vadd.f32 %v265_v46, %v69_v29 }
 0x1d3   :  { %v268_v48 = vadd.f32 %v260_v47, %v612_v4  ;;  %v276_v53 = vmul.f32 %v341_v50, %v269_v51 }
 0x1d5   :  { %v275_v52 = vmul.f32 %v341_v50, %v268_v48 }
 0x1d7   :  { %277 = vadd.xlane.f32.xlu0 %v275_v52 }
 0x1db   :  { %279 = vadd.xlane.f32.xlu0 %v276_v53 }
 0x260   :  { %v278_v54 = vpop.xlane.xlu0 %277 }
 0x261   :  { %v281_v55 = vmul.f32 0.03125, %v278_v54 }
 0x263   :  { %v283_v56 = vsub.f32 %v268_v48, %v281_v55 }
 0x264   :  { %v280_v57 = vpop.xlane.xlu0 %279 }
 0x265   :  { %v282_v58 = vmul.f32 0.03125, %v280_v57  ;;  %v285_v59 = vmul.f32 %v341_v50, %v283_v56 }
 0x267   :  { %v284_v60 = vsub.f32 %v269_v51, %v282_v58  ;;  %v287_v61 = vmul.f32 %v285_v59, %v285_v59 }
 0x269   :  { %289 = vadd.xlane.f32.xlu1 %v287_v61  ;;  %v286_v62 = vmul.f32 %v341_v50, %v284_v60 }
 0x26b   :  { %v288_v63 = vmul.f32 %v286_v62, %v286_v62 }
 0x26d   :  { %291 = vadd.xlane.f32.xlu1 %v288_v63 }
 0x2f2   :  { %v290_v0 = vpop.xlane.xlu1 %289 }
 0x2f3   :  { %v293_v1 = vmul.f32 0.03125, %v290_v0 }
 0x2f5   :  { %v295_v2 = vadd.f32 1e-05, %v293_v1 }
 0x2f6   :  { %v292_v3 = vpop.xlane.xlu1 %291 }
 0x2f7   :  { %457 = vrsqrt.f32 %v295_v2  ;;  %v294_v4 = vmul.f32 0.03125, %v292_v3 }
 0x2f9   :  { %v296_v5 = vadd.f32 1e-05, %v294_v4 }
 0x2fb   :  { %459 = vrsqrt.f32 %v296_v5 }
 0x304   :  { %v458_v6 = vpop.eup %457 }
 0x305   :  { %v299_v8 = vmul.f32 %v458_v6, %v285_v59 }
 0x307   :  { %v308_v10 = vmul.f32 %v342_v7, %v299_v8 }
 0x308   :  { %v460_v11 = vpop.eup %459 }
 0x309   :  { %v300_v12 = vmul.f32 %v460_v11, %v286_v62  ;;  %v317_v13 = vadd.f32 %v343_v9, %v308_v10 }
 0x30b   :  { %v309_v14 = vmul.f32 %v342_v7, %v300_v12  ;;  %319 = vst [vmem:[#allocation8] sm:$0xff] %v317_v13 }
 0x30d   :  { %v318_v15 = vadd.f32 %v343_v9, %v309_v14 }
 0x30f   :  { %320 = vst [vmem:[#allocation8 + $0x8] sm:$0xff] %v318_v15 }
 0x310   :  { %532 = shalt.err (!%p529_p5)
}
 0x311   :  { %332 = dma.vmem_to_hbm [thread:$0]  %s327_s22, 256, %s641_s7, [#allocation4], %s549_s29, %s549_s29, %s550_s30  }
 0x312   :  { %545 = dma.done.wait [#allocation4], 256  }
 0x313   :  { %546 = vsyncadd [#allocation4], 4294967040 }
 0x314   :  { %336 = vsyncpa [#allocation3], 1 }
 0x315   :  { %337 = vsyncpa [#allocation6], 1 }
 0x316   :  { %338 = vsyncpa [#allocation4], 1 }

// kernel: tpu_custom_call.1
= control target key start
LH: loop header
LB: loop body
LE: loop exit
PB: predicated region body
PF: predicated region fallthrough
CT: control target
= control target key end

     0   :  { %12 = vsyncpa [#allocation3], 0  ;;  %s634_s0 = inlined_call_operand.hbm [shape: f32[16,128], index: 0, kind: input, shape index: {}]   ;;  %s635_s1 = inlined_call_operand.hbm [shape: f32[128,128], index: 1, kind: input, shape index: {}]   ;;  %s636_s2 = inlined_call_operand.vmem [shape: f32[1,128], index: 2, kind: input, shape index: {}]   ;;  %s637_s3 = inlined_call_operand.hbm [shape: f32[128,128], index: 3, kind: input, shape index: {}]   ;;  %s638_s4 = inlined_call_operand.vmem [shape: f32[1,128], index: 4, kind: input, shape index: {}]   ;;  %s639_s5 = inlined_call_operand.vmem [shape: f32[1,128], index: 5, kind: input, shape index: {}]   ;;  %s640_s6 = inlined_call_operand.vmem [shape: f32[1,128], index: 6, kind: input, shape index: {}]   ;;  %s641_s7 = inlined_call_operand.hbm [shape: f32[16,128], index: 7, kind: output, shape index: {}]  }
   0x1   :  { %13 = vsyncpa [#allocation6], 0 }
   0x2   :  { %14 = vsyncpa [#allocation4], 0  ;;  %s547_s24 = smov [#allocation5]   ;;  %s548_s26 = smov [#allocation2]  }
   0x3   :  { %s32_s25 = sshll.u32 %s547_s24, 4  ;;  %s20_s27 = sshll.u32 %s548_s26, 4  ;;  %s33_s25 = int_to_ptr.vmem [resolvable:$true] %s32_s25  ;;  %s21_s27 = int_to_ptr.vmem [resolvable:$true] %s20_s27 }
   0x4   :  { %s469_s28 = scalar_lea.vmem %s33_s25, 2048  ;;  %p474_p1 = scmp.lt.s32.totalorder %s33_s25, %s33_s25 }
   0x5   :  { %p470_p0 = scmp.ne.s32.totalorder %s33_s25, %s469_s28  ;;  %p475_p2 = scmp.lt.s32.totalorder %s469_s28, %s469_s28 }
   0x7   :  { %p476_p3 = por %p475_p2, %p474_p1 }
   0x9   :  { %p477_p4 = pnand %p476_p3, %p470_p0 }
   0xb   :  { %480 = shalt.err (!%p477_p4)
}
   0xc   :  { %s549_s29 = smov 128   ;;  %s550_s30 = smov 8  }
   0xd   :  { %38 = dma.hbm_to_vmem [thread:$0]  %s635_s1, 2048, %s33_s25, [#allocation6], %s549_s29, %s549_s29, %s550_s30  }
   0xe   :  { %s489_s10 = scalar_lea.vmem %s21_s27, 256  ;;  %p494_p6 = scmp.lt.s32.totalorder %s21_s27, %s21_s27 }
   0xf   :  { %p490_p5 = scmp.ne.s32.totalorder %s21_s27, %s489_s10  ;;  %p495_p7 = scmp.lt.s32.totalorder %s489_s10, %s489_s10 }
  0x11   :  { %p496_p8 = por %p495_p7, %p494_p6 }
  0x13   :  { %p497_p9 = pnand %p496_p8, %p490_p5 }
  0x15   :  { %500 = shalt.err (!%p497_p9)
}
  0x16   :  { %26 = dma.hbm_to_vmem [thread:$0]  %s634_s0, 256, %s21_s27, [#allocation3], %s549_s29, %s549_s29, %s550_s30  }
  0x17   :  { %s551_s13 = smov [#allocation7]  }
  0x18   :  { %s46_s14 = sshll.u32 %s551_s13, 4  ;;  %s47_s14 = int_to_ptr.vmem [resolvable:$true] %s46_s14 }
  0x19   :  { %s509_s15 = scalar_lea.vmem %s47_s14, 2048  ;;  %p514_p11 = scmp.lt.s32.totalorder %s47_s14, %s47_s14 }
  0x1a   :  { %p510_p10 = scmp.ne.s32.totalorder %s47_s14, %s509_s15  ;;  %p515_p12 = scmp.lt.s32.totalorder %s509_s15, %s509_s15 }
  0x1c   :  { %p516_p13 = por %p515_p12, %p514_p11 }
  0x1e   :  { %p517_p0 = pnand %p516_p13, %p510_p10 }
  0x20   :  { %520 = shalt.err (!%p517_p0)
}
  0x21   :  { %52 = dma.hbm_to_vmem [thread:$0]  %s637_s3, 2048, %s47_s14, [#allocation6], %s549_s29, %s549_s29, %s550_s30  }
  0x22   :  { %541 = dma.done.wait [#allocation3], 256  }
  0x23   :  { %542 = vsyncadd [#allocation3], 4294967040 }
  0x24   :  { %543 = dma.done.wait [#allocation6], 4096  }
  0x25   :  { %544 = vsyncadd [#allocation6], 4294963200  ;;  %v85_v0 = vld [vmem:[#allocation5 + $0x78] sm:$0xff]  ;;  %v84_v1 = vld [vmem:[#allocation5 + $0x70] sm:$0xff]  ;;  %v270_v41 = vlaneseq  ;;  %v552_v49 = vmov 0.0   ;;  %s553_s21 = smov [#allocation8]  }
  0x26   :  { %380 = vmatprep.subr.mxu0 %v85_v0  ;;  %v83_v2 = vld [vmem:[#allocation5 + $0x68] sm:$0xff]  ;;  %v82_v3 = vld [vmem:[#allocation5 + $0x60] sm:$0xff]  ;;  %v612_v4 = vld [vmem:[#allocation2] sm:$0xff]  ;;  %s326_s22 = sshll.u32 %s553_s21, 4  ;;  %s327_s22 = int_to_ptr.vmem [resolvable:$true] %s326_s22 }
  0x27   :  { %381 = vmatpush3.msra.mxu0 %v85_v0  ;;  %v81_v5 = vld [vmem:[#allocation5 + $0x58] sm:$0xff]  ;;  %412 = vmatprep.mubr.f32.mxu0 %v612_v4  ;;  %v184_v7 = vld [vmem:[#allocation7 + $0x70] sm:$0xff]  ;;  %v183_v9 = vld [vmem:[#allocation7 + $0x68] sm:$0xff]  ;;  %v271_v42 = vand.u32 127, %v270_v41  ;;  %s521_s23 = scalar_lea.vmem %s327_s22, 256  ;;  %p526_p2 = scmp.lt.s32.totalorder %s327_s22, %s327_s22 }
  0x28   :  { %382 = vmatprep.subr.mxu0 %v84_v1  ;;  %v185_v6 = vld [vmem:[#allocation7 + $0x78] sm:$0xff]  ;;  %v80_v8 = vld [vmem:[#allocation5 + $0x50] sm:$0xff]  ;;  %v79_v10 = vld [vmem:[#allocation5 + $0x48] sm:$0xff]  ;;  %p522_p1 = scmp.ne.s32.totalorder %s327_s22, %s521_s23  ;;  %p527_p3 = scmp.lt.s32.totalorder %s521_s23, %s521_s23 }
  0x29   :  { %383 = vmatpush3.msra.mxu0 %v84_v1  ;;  %415 = vmatprep.subr.mxu1 %v185_v6  ;;  %v182_v11 = vld [vmem:[#allocation7 + $0x60] sm:$0xff]  ;;  %v181_v13 = vld [vmem:[#allocation7 + $0x58] sm:$0xff]  ;;  %v180_v15 = vld [vmem:[#allocation7 + $0x50] sm:$0xff]  ;;  %vm272_vm0 = vcmp.lt.s32.totalorder %v271_v42, 32 }
  0x2a   :  { %384 = vmatprep.subr.mxu0 %v83_v2  ;;  %416 = vmatpush3.msra.mxu1 %v185_v6  ;;  %v78_v12 = vld [vmem:[#allocation5 + $0x40] sm:$0xff]  ;;  %v77_v14 = vld [vmem:[#allocation5 + $0x38] sm:$0xff]  ;;  %v76_v16 = vld [vmem:[#allocation5 + $0x30] sm:$0xff]  ;;  %v341_v50 = vsel %vm272_vm0, 1.0, %v552_v49  ;;  %p528_p4 = por %p527_p3, %p526_p2 }
  0x2b   :  { %385 = vmatpush3.msra.mxu0 %v83_v2  ;;  %417 = vmatprep.subr.mxu1 %v184_v7  ;;  %v179_v17 = vld [vmem:[#allocation7 + $0x48] sm:$0xff]  ;;  %v178_v19 = vld [vmem:[#allocation7 + $0x40] sm:$0xff]  ;;  %v177_v21 = vld [vmem:[#allocation7 + $0x38] sm:$0xff] }
  0x2c   :  { %386 = vmatprep.subr.mxu0 %v82_v3  ;;  %418 = vmatpush3.msra.mxu1 %v184_v7  ;;  %v75_v18 = vld [vmem:[#allocation5 + $0x28] sm:$0xff]  ;;  %v74_v20 = vld [vmem:[#allocation5 + $0x20] sm:$0xff]  ;;  %v73_v22 = vld [vmem:[#allocation5 + $0x18] sm:$0xff]  ;;  %p529_p5 = pnand %p528_p4, %p522_p1 }
  0x2d   :  { %387 = vmatpush3.msra.mxu0 %v82_v3  ;;  %419 = vmatprep.subr.mxu1 %v183_v9  ;;  %v176_v23 = vld [vmem:[#allocation7 + $0x30] sm:$0xff]  ;;  %v175_v25 = vld [vmem:[#allocation7 + $0x28] sm:$0xff]  ;;  %v174_v27 = vld [vmem:[#allocation7 + $0x20] sm:$0xff] }
  0x2e   :  { %388 = vmatprep.subr.mxu0 %v81_v5  ;;  %420 = vmatpush3.msra.mxu1 %v183_v9  ;;  %v72_v24 = vld [vmem:[#allocation5 + $0x10] sm:$0xff]  ;;  %v71_v26 = vld [vmem:[#allocation5 + $0x8] sm:$0xff]  ;;  %v70_v28 = vld [vmem:[#allocation5] sm:$0xff] }
  0x2f   :  { %389 = vmatpush3.msra.mxu0 %v81_v5  ;;  %421 = vmatprep.subr.mxu1 %v182_v11  ;;  %v69_v29 = vld [vmem:[#allocation2 + $0x8] sm:$0xff]  ;;  %v172_v31 = vld [vmem:[#allocation7 + $0x10] sm:$0xff]  ;;  %v171_v32 = vld [vmem:[#allocation7 + $0x8] sm:$0xff] }
  0x30   :  { %390 = vmatprep.subr.mxu0 %v80_v8  ;;  %422 = vmatpush3.msra.mxu1 %v182_v11  ;;  %v173_v30 = vld [vmem:[#allocation7 + $0x18] sm:$0xff]  ;;  %v170_v33 = vld [vmem:[#allocation7] sm:$0xff]  ;;  %v339_v34 = vld [vmem:[%s636_s2] ss:$0 sm:$0xff] }
  0x31   :  { %391 = vmatpush3.msra.mxu0 %v80_v8  ;;  %423 = vmatprep.subr.mxu1 %v181_v13  ;;  %v340_v44 = vld [vmem:[%s638_s4] ss:$0 sm:$0xff] }
  0x32   :  { %392 = vmatprep.subr.mxu0 %v79_v10  ;;  %424 = vmatpush3.msra.mxu1 %v181_v13  ;;  %v342_v7 = vld [vmem:[%s639_s5] ss:$0 sm:$0xff] }
  0x33   :  { %393 = vmatpush3.msra.mxu0 %v79_v10  ;;  %425 = vmatprep.subr.mxu1 %v180_v15  ;;  %v343_v9 = vld [vmem:[%s640_s6] ss:$0 sm:$0xff] }
  0x34   :  { %394 = vmatprep.subr.mxu0 %v78_v12  ;;  %426 = vmatpush3.msra.mxu1 %v180_v15 }
  0x35   :  { %395 = vmatpush3.msra.mxu0 %v78_v12  ;;  %427 = vmatprep.subr.mxu1 %v179_v17 }
  0x36   :  { %396 = vmatprep.subr.mxu0 %v77_v14  ;;  %428 = vmatpush3.msra.mxu1 %v179_v17 }
  0x37   :  { %397 = vmatpush3.msra.mxu0 %v77_v14  ;;  %429 = vmatprep.subr.mxu1 %v178_v19 }
  0x38   :  { %398 = vmatprep.subr.mxu0 %v76_v16  ;;  %430 = vmatpush3.msra.mxu1 %v178_v19 }
  0x39   :  { %399 = vmatpush3.msra.mxu0 %v76_v16  ;;  %431 = vmatprep.subr.mxu1 %v177_v21 }
  0x3a   :  { %400 = vmatprep.subr.mxu0 %v75_v18  ;;  %432 = vmatpush3.msra.mxu1 %v177_v21 }
  0x3b   :  { %401 = vmatpush3.msra.mxu0 %v75_v18  ;;  %433 = vmatprep.subr.mxu1 %v176_v23 }
  0x3c   :  { %402 = vmatprep.subr.mxu0 %v74_v20  ;;  %434 = vmatpush3.msra.mxu1 %v176_v23 }
  0x3d   :  { %403 = vmatpush3.msra.mxu0 %v74_v20  ;;  %435 = vmatprep.subr.mxu1 %v175_v25 }
  0x3e   :  { %404 = vmatprep.subr.mxu0 %v73_v22  ;;  %436 = vmatpush3.msra.mxu1 %v175_v25 }
  0x3f   :  { %405 = vmatpush3.msra.mxu0 %v73_v22  ;;  %437 = vmatprep.subr.mxu1 %v174_v27 }
  0x40   :  { %406 = vmatprep.subr.mxu0 %v72_v24  ;;  %438 = vmatpush3.msra.mxu1 %v174_v27 }
  0x41   :  { %407 = vmatpush3.msra.mxu0 %v72_v24  ;;  %439 = vmatprep.subr.mxu1 %v173_v30 }
  0x42   :  { %408 = vmatprep.subr.mxu0 %v71_v26  ;;  %440 = vmatpush3.msra.mxu1 %v173_v30 }
  0x43   :  { %409 = vmatpush3.msra.mxu0 %v71_v26  ;;  %441 = vmatprep.subr.mxu1 %v172_v31 }
  0x44   :  { %410 = vmatprep.subr.mxu0 %v70_v28  ;;  %442 = vmatpush3.msra.mxu1 %v172_v31 }
  0x45   :  { %411 = vmatpush3.msra.mxu0 %v70_v28  ;;  %443 = vmatprep.subr.mxu1 %v171_v32 }
  0x46   :  { %413 = vmatmul.mubr.f32.vlgmr.msra.gmra.mxu0 %v69_v29  ;;  %444 = vmatpush3.msra.mxu1 %v171_v32 }
  0x47   :  { %445 = vmatprep.subr.mxu1 %v170_v33 }
  0x48   :  { %446 = vmatpush3.msra.mxu1 %v170_v33 }
 0x106   :  { %v414_v35 = vpop.f32.mrf.mxu0 }
 0x107   :  { %v165_v36 = vadd.f32 %v414_v35, %v339_v34 }
 0x108   :  { %v159_v37 = vpop.f32.mrf.mxu0 }
 0x109   :  { %v160_v38 = vadd.f32 %v339_v34, %v159_v37  ;;  %v169_v40 = vmax.f32 %v165_v36, 0.0 }
 0x10b   :  { %v168_v39 = vmax.f32 %v160_v38, 0.0 }
 0x10d   :  { %447 = vmatprep.mubr.f32.mxu1 %v168_v39 }
 0x10e   :  { %448 = vmatmul.mubr.f32.vlgmr.msra.gmra.mxu1 %v169_v40 }
 0x1ce   :  { %v449_v43 = vpop.f32.mrf.mxu1 }
 0x1cf   :  { %v265_v46 = vadd.f32 %v449_v43, %v340_v44 }
 0x1d0   :  { %v259_v45 = vpop.f32.mrf.mxu1 }
 0x1d1   :  { %v260_v47 = vadd.f32 %v340_v44, %v259_v45  ;;  %v269_v51 = vadd.f32 %v265_v46, %v69_v29 }
 0x1d3   :  { %v268_v48 = vadd.f32 %v260_v47, %v612_v4  ;;  %v276_v53 = vmul.f32 %v341_v50, %v269_v51 }
 0x1d5   :  { %v275_v52 = vmul.f32 %v341_v50, %v268_v48 }
 0x1d7   :  { %277 = vadd.xlane.f32.xlu0 %v275_v52 }
 0x1db   :  { %279 = vadd.xlane.f32.xlu0 %v276_v53 }
 0x260   :  { %v278_v54 = vpop.xlane.xlu0 %277 }
 0x261   :  { %v281_v55 = vmul.f32 0.03125, %v278_v54 }
 0x263   :  { %v283_v56 = vsub.f32 %v268_v48, %v281_v55 }
 0x264   :  { %v280_v57 = vpop.xlane.xlu0 %279 }
 0x265   :  { %v282_v58 = vmul.f32 0.03125, %v280_v57  ;;  %v285_v59 = vmul.f32 %v341_v50, %v283_v56 }
 0x267   :  { %v284_v60 = vsub.f32 %v269_v51, %v282_v58  ;;  %v287_v61 = vmul.f32 %v285_v59, %v285_v59 }
 0x269   :  { %289 = vadd.xlane.f32.xlu1 %v287_v61  ;;  %v286_v62 = vmul.f32 %v341_v50, %v284_v60 }
 0x26b   :  { %v288_v63 = vmul.f32 %v286_v62, %v286_v62 }
 0x26d   :  { %291 = vadd.xlane.f32.xlu1 %v288_v63 }
 0x2f2   :  { %v290_v0 = vpop.xlane.xlu1 %289 }
 0x2f3   :  { %v293_v1 = vmul.f32 0.03125, %v290_v0 }
 0x2f5   :  { %v295_v2 = vadd.f32 1e-05, %v293_v1 }
 0x2f6   :  { %v292_v3 = vpop.xlane.xlu1 %291 }
 0x2f7   :  { %457 = vrsqrt.f32 %v295_v2  ;;  %v294_v4 = vmul.f32 0.03125, %v292_v3 }
 0x2f9   :  { %v296_v5 = vadd.f32 1e-05, %v294_v4 }
 0x2fb   :  { %459 = vrsqrt.f32 %v296_v5 }
 0x304   :  { %v458_v6 = vpop.eup %457 }
 0x305   :  { %v299_v8 = vmul.f32 %v458_v6, %v285_v59 }
 0x307   :  { %v308_v10 = vmul.f32 %v342_v7, %v299_v8 }
 0x308   :  { %v460_v11 = vpop.eup %459 }
 0x309   :  { %v300_v12 = vmul.f32 %v460_v11, %v286_v62  ;;  %v317_v13 = vadd.f32 %v343_v9, %v308_v10 }
 0x30b   :  { %v309_v14 = vmul.f32 %v342_v7, %v300_v12  ;;  %319 = vst [vmem:[#allocation8] sm:$0xff] %v317_v13 }
 0x30d   :  { %v318_v15 = vadd.f32 %v343_v9, %v309_v14 }
 0x30f   :  { %320 = vst [vmem:[#allocation8 + $0x8] sm:$0xff] %v318_v15 }
 0x310   :  { %532 = shalt.err (!%p529_p5)
}
 0x311   :  { %332 = dma.vmem_to_hbm [thread:$0]  %s327_s22, 256, %s641_s7, [#allocation4], %s549_s29, %s549_s29, %s550_s30  }
 0x312   :  { %545 = dma.done.wait [#allocation4], 256  }
 0x313   :  { %546 = vsyncadd [#allocation4], 4294967040 }
 0x314   :  { %336 = vsyncpa [#allocation3], 1 }
 0x315   :  { %337 = vsyncpa [#allocation6], 1 }
 0x316   :  { %338 = vsyncpa [#allocation4], 1 }

</bundles_post_ra>
